<compile_context>
chip_gen: v6e
topology: v6e:2x2x1
jax: 0.10.0
libtpu: 0.0.40
codegen_flags: <defaults>
</compile_context>

<pallas_src>
import math
from typing import NamedTuple, Optional

import jax
import jax.numpy as jnp
from jax.experimental import pallas as pl
from jax.experimental.pallas import tpu as pltpu


def _round_up(x, m):
    return (x + m - 1) // m * m


def _probe_pipeline_mode():
    """Best-effort check that BlockSpec accepts pipeline_mode=pl.Buffered(1)."""
    if not hasattr(pl, "Buffered"):
        return False
    try:
        pl.BlockSpec((8, 128), lambda i: (0, 0), pipeline_mode=pl.Buffered(1))
        return True
    except Exception:
        return False


_HAS_PIPELINE_MODE = _probe_pipeline_mode()


def _tpu_vmem_and_cores():
    """Best-effort (vmem_capacity_bytes, tensorcores_per_chip)."""
    vmem = 64 << 20          # conservative fallback (v7x-sized)
    cores = 1
    try:
        vmem = int(pltpu.get_tpu_info().vmem_capacity_bytes)
    except Exception:
        pass
    try:
        kind = jax.devices()[0].device_kind.lower()
        if "7" in kind:      # v7x: 2 TensorCores per chip share the grid
            cores = 2
    except Exception:
        pass
    return vmem, cores


def _largest_divisor_tile(total, cap, unit=128):
    """Largest multiple of `unit` that divides `total` (itself a multiple of
    `unit`) and is <= cap."""
    q = total // unit
    f_cap = max(1, min(q, cap // unit))
    for f in range(f_cap, 0, -1):
        if q % f == 0:
            return f * unit
    return unit


# ---------------------------------------------------------------------------
# Parameter preparation (hoisted out of the per-call forward pass).
# ---------------------------------------------------------------------------
class RefinerParams(NamedTuple):
    w1p: jax.Array   # (d_in_p, d_hid_p) bf16, zero-padded to 128 multiples
    b1p: jax.Array   # (1, d_hid_p)      f32
    w2p: jax.Array   # (d_hid_p, d_out_p) bf16
    b2p: jax.Array   # (1, d_out_p)      f32
    d_in: int
    d_hid: int
    d_out: int


def prepare_refiner_params(w1, b1, w2, b2):
    """Pad + cast the Linear weights once.  w1: (d_in, d_hid), w2: (d_hid,
    d_out) stored pre-transposed (y = x @ w + b); biases (d,) or (1, d)."""
    d_in, d_hid = w1.shape
    d_out = w2.shape[1]
    d_in_p, d_hid_p, d_out_p = (_round_up(d, 128) for d in (d_in, d_hid, d_out))
    w1p = jnp.pad(w1.astype(jnp.bfloat16),
                  ((0, d_in_p - d_in), (0, d_hid_p - d_hid)))
    w2p = jnp.pad(w2.astype(jnp.bfloat16),
                  ((0, d_hid_p - d_hid), (0, d_out_p - d_out)))
    b1p = jnp.pad(jnp.reshape(b1, (1, -1)).astype(jnp.float32),
                  ((0, 0), (0, d_hid_p - d_hid)))
    b2p = jnp.pad(jnp.reshape(b2, (1, -1)).astype(jnp.float32),
                  ((0, 0), (0, d_out_p - d_out)))
    return RefinerParams(w1p, b1p, w2p, b2p, d_in, d_hid, d_out)


# ---------------------------------------------------------------------------
# Kernels
# ---------------------------------------------------------------------------
def _mlp_kernel_resident(x_ref, w1_ref, b1_ref, w2_ref, b2_ref, o_ref):
    # Both weight matrices resident in VMEM; one grid axis over row tiles.
    x = x_ref[...].astype(w1_ref.dtype)            # f32 -> bf16 on the VPU
    h = jnp.dot(x, w1_ref[...], preferred_element_type=jnp.float32)
    h = jnp.maximum(h + b1_ref[...], 0.0)          # bias + ReLU in f32
    # Dropout(0.2): identity at inference time.
    # TODO(synk): training-mode dropout via pltpu.prng_seed/prng_random_bits.
    y = jnp.dot(h.astype(w2_ref.dtype), w2_ref[...],
                preferred_element_type=jnp.float32)
    o_ref[...] = (y + b2_ref[...]).astype(o_ref.dtype)   # lane-dense store


def _mlp_kernel_tiled(x_ref, w1_ref, b1_ref, w2_ref, b2_ref, o_ref,
                      h_acc, y_acc):
    # grid = (row tiles, hidden tiles j, input tiles k); j,k are reductions.
    j = pl.program_id(1)
    k = pl.program_id(2)
    nj = pl.num_programs(1)
    nk = pl.num_programs(2)

    @pl.when((j == 0) & (k == 0))
    def _():
        y_acc[...] = jnp.zeros_like(y_acc)

    @pl.when(k == 0)
    def _():
        h_acc[...] = jnp.zeros_like(h_acc)

    h_acc[...] += jnp.dot(x_ref[...].astype(w1_ref.dtype), w1_ref[...],
                          preferred_element_type=jnp.float32)

    @pl.when(k == nk - 1)
    def _():
        h = jnp.maximum(h_acc[...] + b1_ref[...], 0.0)   # bias + ReLU
        # Dropout(0.2): identity at inference time.
        y_acc[...] += jnp.dot(h.astype(w2_ref.dtype), w2_ref[...],
                              preferred_element_type=jnp.float32)

    @pl.when((j == nj - 1) & (k == nk - 1))
    def _():
        o_ref[...] = (y_acc[...] + b2_ref[...]).astype(o_ref.dtype)


# ---------------------------------------------------------------------------
# Tiling plan
# ---------------------------------------------------------------------------
_BM_CANDIDATES = (2048, 1024, 512, 256, 128, 64, 32, 16, 8)


def _plan(n, x_itemsize, d_in_p, d_hid_p, d_out_p, budget, n_cores,
          mode=None, block_m=None, block_k=None, block_h=None):
    n8 = _round_up(max(n, 8), 8)

    def clamp_bm(bm):
        bm = min(bm, n8)
        if n_cores > 1 and n8 >= 8 * n_cores:
            # Keep >= n_cores grid steps so every v7x TensorCore gets work;
            # single-TC chips (v5e/v6e) keep the largest tile that fits.
            bm = min(bm, max(8, (n8 // n_cores) // 8 * 8))
        return bm

    # ---- resident-weight plan --------------------------------------------
    w_bytes_1buf = 2 * (d_in_p * d_hid_p + d_hid_p * d_out_p)   # bf16 W1+W2
    pin = _HAS_PIPELINE_MODE and w_bytes_1buf > (4 << 20)       # best-effort
    w_buf = 1 if pin else 2
    resident_fixed = w_buf * (w_bytes_1buf + 4 * (d_hid_p + d_out_p))
    resident_per_row = (
        2 * x_itemsize * d_in_p      # x tile (input dtype), double-buffered
        + 4 * d_hid_p                # f32 hidden temporary
        + 2 * d_hid_p                # bf16 hidden copy fed to 2nd matmul
        + 2 * 4 * d_out_p)           # f32 out tile, double-buffered

    resident_ok = resident_fixed + 8 * resident_per_row <= budget
    if mode == "resident" and not resident_ok:
        raise ValueError("resident mode requested but weights + minimal row "
                         "tile exceed the VMEM budget; use mode='tiled'")
    if (mode in (None, "resident")) and resident_ok:
        if block_m is None:
            bm = 8
            for cand in _BM_CANDIDATES:
                if resident_fixed + cand * resident_per_row <= budget:
                    bm = cand
                    break
            bm = clamp_bm(bm)
        else:
            bm = block_m
        return dict(mode="resident", block_m=bm, pin_weights=pin)

    # ---- K/H-tiled plan ----------------------------------------------------
    bk = block_k or _largest_divisor_tile(d_in_p, 512)
    bh = block_h or _largest_divisor_tile(d_hid_p, 512)

    def tiled_bytes(bm, bk, bh):
        return (2 * x_itemsize * bm * bk     # x tile, double-buffered
                + 2 * 2 * bk * bh            # W1 block (bf16), double-buffered
                + 2 * 4 * bh                 # b1 block
                + 2 * 2 * bh * d_out_p       # W2 block (bf16), double-buffered
                + 2 * 4 * d_out_p            # b2
                + 2 * 4 * bm * d_out_p       # f32 out tile, double-buffered
                + 4 * bm * bh                # f32 hidden accumulator scratch
                + 2 * bm * bh                # bf16 copy of activated hidden
                + 4 * bm * d_out_p)          # f32 output accumulator scratch

    while True:
        bm = block_m or 0
        if not bm:
            for cand in _BM_CANDIDATES:
                if tiled_bytes(cand, bk, bh) <= budget:
                    bm = cand
                    break
        if bm:
            if block_m is None:
                bm = clamp_bm(bm)
            return dict(mode="tiled", block_m=bm, block_k=bk, block_h=bh)
        if block_k is None and bk > 128:
            bk = _largest_divisor_tile(d_in_p, bk // 2)
        elif block_h is None and bh > 128:
            bh = _largest_divisor_tile(d_hid_p, bh // 2)
        else:
            raise ValueError(
                f"EnsembleRefiner kernel does not fit the VMEM budget "
                f"({budget} bytes) even at minimal tiles "
                f"(d_in_p={d_in_p}, d_hid_p={d_hid_p}, d_out_p={d_out_p}).")


# ---------------------------------------------------------------------------
# Forward pass
# ---------------------------------------------------------------------------
def ensemble_refiner_forward(x, params: RefinerParams, *, mode=None,
                             block_m=None, block_k=None, block_h=None):
    """x: (N, input_dim) -> (N, output_dim).  Inference-mode forward."""
    n, d_in = x.shape
    assert d_in == params.d_in, (d_in, params.d_in)
    d_out = params.d_out
    out_dtype = x.dtype

    d_in_p, d_hid_p = params.w1p.shape
    d_out_p = params.w2p.shape[1]

    vmem_cap, n_cores = _tpu_vmem_and_cores()
    vmem_limit = min(int(vmem_cap * 0.8), 96 << 20)   # generation-aware
    budget = int(vmem_limit * 0.75)                   # compiler-temp headroom

    plan = _plan(n, x.dtype.itemsize, d_in_p, d_hid_p, d_out_p, budget,
                 n_cores, mode=mode, block_m=block_m, block_k=block_k,
                 block_h=block_h)
    bm = plan["block_m"]
    n_pad = _round_up(max(n, bm), bm)

    xp = x
    if (n_pad, d_in_p) != (n, d_in):
        xp = jnp.pad(x, ((0, n_pad - n), (0, d_in_p - d_in)))

    m_tiles = n_pad // bm
    flops = 2 * n_pad * (d_in_p * d_hid_p + d_hid_p * d_out_p)
    w_hbm = 2 * (d_in_p * d_hid_p + d_hid_p * d_out_p) + 4 * (d_hid_p + d_out_p)
    bytes_accessed = (n_pad * d_in_p * x.dtype.itemsize
                      + n_pad * d_out_p * jnp.dtype(out_dtype).itemsize
                      + w_hbm * (m_tiles if plan["mode"] == "tiled" else 1))
    cost = pl.CostEstimate(flops=flops, transcendentals=0,
                           bytes_accessed=bytes_accessed)

    if plan["mode"] == "resident":
        def _res_spec(shape):
            # Resident operand: constant index_map; request single buffering
            # when it saves meaningful VMEM (best-effort).
            if plan["pin_weights"]:
                return pl.BlockSpec(shape, lambda i: (0, 0),
                                    pipeline_mode=pl.Buffered(1))
            return pl.BlockSpec(shape, lambda i: (0, 0))

        out = pl.pallas_call(
            _mlp_kernel_resident,
            out_shape=jax.ShapeDtypeStruct((n_pad, d_out_p), out_dtype),
            grid_spec=pltpu.PrefetchScalarGridSpec(
                num_scalar_prefetch=0,
                grid=(n_pad // bm,),
                in_specs=[
                    pl.BlockSpec((bm, d_in_p), lambda i: (i, 0)),   # x tile
                    _res_spec((d_in_p, d_hid_p)),                   # W1
                    _res_spec((1, d_hid_p)),                        # b1
                    _res_spec((d_hid_p, d_out_p)),                  # W2
                    _res_spec((1, d_out_p)),                        # b2
                ],
                out_specs=pl.BlockSpec((bm, d_out_p), lambda i: (i, 0)),
            ),
            compiler_params=pltpu.CompilerParams(
                dimension_semantics=("parallel",),
                vmem_limit_bytes=vmem_limit),
            cost_estimate=cost,
        )(xp, params.w1p, params.b1p, params.w2p, params.b2p)
    else:
        bk, bh = plan["block_k"], plan["block_h"]
        # TODO(synk): if profiling on v7x shows exposed x-tile DMA, sweep
        # pipeline_mode=pl.Buffered(3) on the x BlockSpec.
        out = pl.pallas_call(
            _mlp_kernel_tiled,
            out_shape=jax.ShapeDtypeStruct((n_pad, d_out_p), out_dtype),
            grid_spec=pltpu.PrefetchScalarGridSpec(
                num_scalar_prefetch=0,
                grid=(n_pad // bm, d_hid_p // bh, d_in_p // bk),
                in_specs=[
                    pl.BlockSpec((bm, bk), lambda i, j, k: (i, k)),       # x
                    pl.BlockSpec((bk, bh), lambda i, j, k: (k, j)),       # W1
                    pl.BlockSpec((1, bh), lambda i, j, k: (0, j)),        # b1
                    pl.BlockSpec((bh, d_out_p), lambda i, j, k: (j, 0)),  # W2
                    pl.BlockSpec((1, d_out_p), lambda i, j, k: (0, 0)),   # b2
                ],
                out_specs=pl.BlockSpec((bm, d_out_p), lambda i, j, k: (i, 0)),
                scratch_shapes=[
                    pltpu.VMEM((bm, bh), jnp.float32),       # hidden acc
                    pltpu.VMEM((bm, d_out_p), jnp.float32),  # output acc
                ],
            ),
            compiler_params=pltpu.CompilerParams(
                dimension_semantics=("parallel", "arbitrary", "arbitrary"),
                vmem_limit_bytes=vmem_limit),
            cost_estimate=cost,
        )(xp, params.w1p, params.b1p, params.w2p, params.b2p)

    if (n_pad, d_out_p) != (n, d_out):
        # TODO(synk): let fused consumers read the padded lane-dense slab to
        # avoid this extra slice pass when d_out << 128.
        out = out[:n, :d_out]
    return out


def init_params(key, input_dim, hidden_dim, output_dim, dtype=jnp.float32):
    """nn.Linear-style init (uniform +/- 1/sqrt(fan_in)); weights (in, out)."""
    k1, k2, k3, k4 = jax.random.split(key, 4)
    lim1 = 1.0 / math.sqrt(input_dim)
    lim2 = 1.0 / math.sqrt(hidden_dim)
    w1 = jax.random.uniform(k1, (input_dim, hidden_dim), dtype, -lim1, lim1)
    b1 = jax.random.uniform(k2, (hidden_dim,), dtype, -lim1, lim1)
    w2 = jax.random.uniform(k3, (hidden_dim, output_dim), dtype, -lim2, lim2)
    b2 = jax.random.uniform(k4, (output_dim,), dtype, -lim2, lim2)
    return w1, b1, w2, b2


if __name__ == "__main__":
    key = jax.random.PRNGKey(0)

    def reference(x, w1, b1, w2, b2):
        # Mirror the kernel's bf16 operand rounding / f32 accumulation.
        xb = x.astype(jnp.bfloat16).astype(jnp.float32)
        w1b = w1.astype(jnp.bfloat16).astype(jnp.float32)
        w2b = w2.astype(jnp.bfloat16).astype(jnp.float32)
        h = jnp.maximum(xb @ w1b + b1.reshape(1, -1), 0.0)
        return h.astype(jnp.bfloat16).astype(jnp.float32) @ w2b + b2.reshape(1, -1)

    # Case 1: small shapes -> resident-weight kernel (auto-selected).
    batch, d_in, d_hid, d_out = 8, 32, 64, 16
    kx, kp = jax.random.split(key)
    x = jax.random.normal(kx, (batch, d_in), jnp.float32)
    w1, b1, w2, b2 = init_params(kp, d_in, d_hid, d_out)
    params = prepare_refiner_params(w1, b1, w2, b2)   # padding/cast hoisted
    out = jax.block_until_ready(ensemble_refiner_forward(x, params))
    assert out.shape == (batch, d_out)
    ref = reference(x, w1, b1, w2, b2)
    assert jnp.allclose(out, ref, atol=2e-2, rtol=2e-2), (
        float(jnp.max(jnp.abs(out - ref))))

    # Case 2: force the K/H-tiled accumulator kernel (multi-step reduction).
    batch2, d_in2, d_hid2, d_out2 = 24, 320, 400, 48
    kx2, kp2 = jax.random.split(kp)
    x2 = jax.random.normal(kx2, (batch2, d_in2), jnp.float32)
    w1_2, b1_2, w2_2, b2_2 = init_params(kp2, d_in2, d_hid2, d_out2)
    params2 = prepare_refiner_params(w1_2, b1_2, w2_2, b2_2)
    out2 = jax.block_until_ready(
        ensemble_refiner_forward(x2, params2, mode="tiled",
                                 block_m=16, block_k=128, block_h=128))
    assert out2.shape == (batch2, d_out2)
    ref2 = reference(x2, w1_2, b1_2, w2_2, b2_2)
    assert jnp.allclose(out2, ref2, atol=2e-2, rtol=2e-2), (
        float(jnp.max(jnp.abs(out2 - ref2))))

    print("KERNEL_OK")
</pallas_src>

<mosaic_0001>
module attributes {stable_mosaic.version = 11 : i64} {
  func.func @_mlp_kernel_resident(%arg0: i32, %arg1: memref<8x128xf32, #tpu.memory_space<vmem>>, %arg2: memref<128x128xbf16, #tpu.memory_space<vmem>>, %arg3: memref<1x128xf32, #tpu.memory_space<vmem>>, %arg4: memref<128x128xbf16, #tpu.memory_space<vmem>>, %arg5: memref<1x128xf32, #tpu.memory_space<vmem>>, %arg6: memref<8x128xf32, #tpu.memory_space<vmem>>) attributes {dimension_semantics = [#tpu.dimension_semantics<parallel>], iteration_bounds = array<i64: 1>, scalar_prefetch = 0 : i64, scratch_operands = 0 : i64, tpu.core_type = #tpu.core_type<tc>, window_params = [{transform_indices = @transform_0, window_bounds = array<i64: 8, 128>}, {pipeline_mode = #tpu.pipeline_mode<synchronous>, transform_indices = @transform_1, window_bounds = array<i64: 128, 128>}, {pipeline_mode = #tpu.pipeline_mode<synchronous>, transform_indices = @transform_2, window_bounds = array<i64: 1, 128>}, {pipeline_mode = #tpu.pipeline_mode<synchronous>, transform_indices = @transform_3, window_bounds = array<i64: 128, 128>}, {pipeline_mode = #tpu.pipeline_mode<synchronous>, transform_indices = @transform_4, window_bounds = array<i64: 1, 128>}, {transform_indices = @transform_5, window_bounds = array<i64: 8, 128>}]} {
    %c0 = arith.constant 0 : index
    %c0_0 = arith.constant 0 : index
    %0 = vector.load %arg1[%c0, %c0_0] : memref<8x128xf32, #tpu.memory_space<vmem>>, vector<8x128xf32>
    %1 = arith.truncf %0 : vector<8x128xf32> to vector<8x128xbf16>
    %c0_1 = arith.constant 0 : index
    %c0_2 = arith.constant 0 : index
    %2 = vector.load %arg2[%c0_1, %c0_2] : memref<128x128xbf16, #tpu.memory_space<vmem>>, vector<128x128xbf16>
    %cst = arith.constant dense<0.000000e+00> : vector<8x128xf32>
    %3 = tpu.matmul %1, %2, %cst {dimension_numbers = #tpu.dot_dimension_numbers<[1], [0], [0], [1], [0, 0, 1, 1], [], []>} : vector<8x128xbf16>, vector<128x128xbf16>, vector<8x128xf32> -> vector<8x128xf32>
    %c0_3 = arith.constant 0 : index
    %c0_4 = arith.constant 0 : index
    %4 = vector.load %arg3[%c0_3, %c0_4] : memref<1x128xf32, #tpu.memory_space<vmem>>, vector<1x128xf32>
    %5 = vector.broadcast %4 : vector<1x128xf32> to vector<8x128xf32>
    %6 = arith.addf %3, %5 : vector<8x128xf32>
    %cst_5 = arith.constant 0.000000e+00 : f32
    %7 = vector.broadcast %cst_5 : f32 to vector<8x128xf32>
    %8 = arith.maximumf %6, %7 : vector<8x128xf32>
    %9 = arith.truncf %8 : vector<8x128xf32> to vector<8x128xbf16>
    %c0_6 = arith.constant 0 : index
    %c0_7 = arith.constant 0 : index
    %10 = vector.load %arg4[%c0_6, %c0_7] : memref<128x128xbf16, #tpu.memory_space<vmem>>, vector<128x128xbf16>
    %cst_8 = arith.constant dense<0.000000e+00> : vector<8x128xf32>
    %11 = tpu.matmul %9, %10, %cst_8 {dimension_numbers = #tpu.dot_dimension_numbers<[1], [0], [0], [1], [0, 0, 1, 1], [], []>} : vector<8x128xbf16>, vector<128x128xbf16>, vector<8x128xf32> -> vector<8x128xf32>
    %c0_9 = arith.constant 0 : index
    %c0_10 = arith.constant 0 : index
    %12 = vector.load %arg5[%c0_9, %c0_10] : memref<1x128xf32, #tpu.memory_space<vmem>>, vector<1x128xf32>
    %13 = vector.broadcast %12 : vector<1x128xf32> to vector<8x128xf32>
    %14 = arith.addf %11, %13 : vector<8x128xf32>
    %c0_11 = arith.constant 0 : index
    %c0_12 = arith.constant 0 : index
    %15 = vector.load %arg6[%c0_11, %c0_12] : memref<8x128xf32, #tpu.memory_space<vmem>>, vector<8x128xf32>
    tpu.vector_store %arg6[%c0_11, %c0_12], %14 {strides = array<i32>} : memref<8x128xf32, #tpu.memory_space<vmem>>, vector<8x128xf32>,
    return
  }
  func.func @transform_0(%arg0: i32) -> (i32, i32) {
    %c0_i32 = arith.constant 0 : i32
    %c0_i32_0 = arith.constant 0 : i32
    return %arg0, %c0_i32 : i32, i32
  }
  func.func @transform_1(%arg0: i32) -> (i32, i32) {
    %c0_i32 = arith.constant 0 : i32
    %c0_i32_0 = arith.constant 0 : i32
    %c0_i32_1 = arith.constant 0 : i32
    return %c0_i32, %c0_i32_0 : i32, i32
  }
  func.func @transform_2(%arg0: i32) -> (i32, i32) {
    %c0_i32 = arith.constant 0 : i32
    %c0_i32_0 = arith.constant 0 : i32
    %c0_i32_1 = arith.constant 0 : i32
    return %c0_i32, %c0_i32_0 : i32, i32
  }
  func.func @transform_3(%arg0: i32) -> (i32, i32) {
    %c0_i32 = arith.constant 0 : i32
    %c0_i32_0 = arith.constant 0 : i32
    %c0_i32_1 = arith.constant 0 : i32
    return %c0_i32, %c0_i32_0 : i32, i32
  }
  func.func @transform_4(%arg0: i32) -> (i32, i32) {
    %c0_i32 = arith.constant 0 : i32
    %c0_i32_0 = arith.constant 0 : i32
    %c0_i32_1 = arith.constant 0 : i32
    return %c0_i32, %c0_i32_0 : i32, i32
  }
  func.func @transform_5(%arg0: i32) -> (i32, i32) {
    %c0_i32 = arith.constant 0 : i32
    %c0_i32_0 = arith.constant 0 : i32
    return %arg0, %c0_i32 : i32, i32
  }
}

</mosaic_0001>

<bundles_post_ra>
// kernel: tpu_custom_call.1
= control target key start
LH: loop header
LB: loop body
LE: loop exit
PB: predicated region body
PF: predicated region fallthrough
CT: control target
= control target key end

     0   :  { %10 = vsyncpa [#allocation3], 0  ;;  %s546_s0 = inlined_call_operand.hbm [shape: f32[8,128], index: 0, kind: input, shape index: {}]   ;;  %s547_s1 = inlined_call_operand.hbm [shape: bf16[128,128], index: 1, kind: input, shape index: {}]   ;;  %s548_s2 = inlined_call_operand.vmem [shape: f32[1,128], index: 2, kind: input, shape index: {}]   ;;  %s549_s3 = inlined_call_operand.hbm [shape: bf16[128,128], index: 3, kind: input, shape index: {}]   ;;  %s550_s4 = inlined_call_operand.vmem [shape: f32[1,128], index: 4, kind: input, shape index: {}]   ;;  %s551_s5 = inlined_call_operand.hbm [shape: f32[8,128], index: 5, kind: output, shape index: {}]  }
   0x1   :  { %11 = vsyncpa [#allocation6], 0 }
   0x2   :  { %12 = vsyncpa [#allocation4], 0  ;;  %s490_s18 = smov [#allocation5]  }
   0x3   :  { %s28_s19 = sshll.u32 %s490_s18, 4  ;;  %s29_s19 = int_to_ptr.vmem [resolvable:$true] %s28_s19 }
   0x4   :  { %s412_s20 = scalar_lea.vmem %s29_s19, 1024  ;;  %p417_p1 = scmp.lt.s32.totalorder %s29_s19, %s29_s19 }
   0x5   :  { %p413_p0 = scmp.ne.s32.totalorder %s29_s19, %s412_s20  ;;  %p418_p2 = scmp.lt.s32.totalorder %s412_s20, %s412_s20 }
   0x7   :  { %p419_p3 = por %p418_p2, %p417_p1 }
   0x9   :  { %p420_p4 = pnand %p419_p3, %p413_p0 }
   0xb   :  { %423 = shalt.err (!%p420_p4)
}
   0xc   :  { %s491_s21 = smov 64   ;;  %s492_s22 = smov 4  }
   0xd   :  { %34 = dma.hbm_to_vmem [thread:$0]  %s547_s1, 1024, %s29_s19, [#allocation6], %s491_s21, %s491_s21, %s492_s22  }
   0xe   :  { %s493_s25 = smov [#allocation2]   ;;  %s494_s27 = smov [#allocation7]  }
   0xf   :  { %s19_s26 = sshll.u32 %s493_s25, 4  ;;  %s42_s28 = sshll.u32 %s494_s27, 4  ;;  %s20_s26 = int_to_ptr.vmem [resolvable:$true] %s19_s26  ;;  %s43_s28 = int_to_ptr.vmem [resolvable:$true] %s42_s28 }
  0x10   :  { %s432_s29 = scalar_lea.vmem %s20_s26, 128  ;;  %p437_p6 = scmp.lt.s32.totalorder %s20_s26, %s20_s26 }
  0x11   :  { %p433_p5 = scmp.ne.s32.totalorder %s20_s26, %s432_s29  ;;  %p438_p7 = scmp.lt.s32.totalorder %s432_s29, %s432_s29 }
  0x13   :  { %p439_p8 = por %p438_p7, %p437_p6 }
  0x15   :  { %p440_p9 = pnand %p439_p8, %p433_p5 }
  0x17   :  { %443 = shalt.err (!%p440_p9)
}
  0x18   :  { %22 = dma.hbm_to_vmem [thread:$0]  %s546_s0, 128, %s20_s26, [#allocation3]  }
  0x19   :  { %s452_s7 = scalar_lea.vmem %s43_s28, 1024  ;;  %p457_p11 = scmp.lt.s32.totalorder %s43_s28, %s43_s28 }
  0x1a   :  { %p453_p10 = scmp.ne.s32.totalorder %s43_s28, %s452_s7  ;;  %p458_p12 = scmp.lt.s32.totalorder %s452_s7, %s452_s7 }
  0x1c   :  { %p459_p13 = por %p458_p12, %p457_p11 }
  0x1e   :  { %p460_p0 = pnand %p459_p13, %p453_p10 }
  0x20   :  { %463 = shalt.err (!%p460_p0)
}
  0x21   :  { %48 = dma.hbm_to_vmem [thread:$0]  %s549_s3, 1024, %s43_s28, [#allocation6], %s491_s21, %s491_s21, %s492_s22  }
  0x22   :  { %484 = dma.done.wait [#allocation3], 128  }
  0x23   :  { %485 = vsyncadd [#allocation3], 4294967168 }
  0x24   :  { %486 = dma.done.wait [#allocation6], 2048  }
  0x25   :  { %487 = vsyncadd [#allocation6], 4294965248  ;;  %v495_v0 = vmov 0.0   ;;  %vm496_vm0 = vmmov 0   ;;  %v388_v1 = vld [vmem:[#allocation5 + $0x38] sm:$0xff]   ;;  %v389_v2 = vld [vmem:[#allocation5 + $0x30] sm:$0xff]  }
  0x26   :  { %340 = vmatprep.subr.bf16.mxu0 %v495_v0  ;;  %356 = vmatprep.mubr.msk.bf16.mxu0 %vm496_vm0, %v495_v0  ;;  %v390_v3 = vld [vmem:[#allocation5 + $0x28] sm:$0xff]   ;;  %v396_v4 = vld [vmem:[#allocation7 + $0x38] sm:$0xff]   ;;  %v391_v5 = vld [vmem:[#allocation5 + $0x20] sm:$0xff]   ;;  %s497_s11 = smov [#allocation8]  }
  0x27   :  { %360 = vmatprep.subr.bf16.mxu1 %v495_v0  ;;  %376 = vmatprep.mubr.msk.bf16.mxu1 %vm496_vm0, %v495_v0  ;;  %v397_v6 = vld [vmem:[#allocation7 + $0x30] sm:$0xff]   ;;  %v392_v7 = vld [vmem:[#allocation5 + $0x18] sm:$0xff]   ;;  %v398_v8 = vld [vmem:[#allocation7 + $0x28] sm:$0xff]   ;;  %s294_s12 = sshll.u32 %s497_s11, 4  ;;  %s295_s12 = int_to_ptr.vmem [resolvable:$true] %s294_s12 }
  0x28   :  { %341 = vmatpush3.bf16.msra.mxu0 %v388_v1  ;;  %361 = vmatpush3.bf16.msra.mxu1 %v396_v4  ;;  %v393_v9 = vld [vmem:[#allocation5 + $0x10] sm:$0xff]   ;;  %v399_v10 = vld [vmem:[#allocation7 + $0x20] sm:$0xff]   ;;  %v394_v11 = vld [vmem:[#allocation5 + $0x8] sm:$0xff]   ;;  %p469_p2 = scmp.lt.s32.totalorder %s295_s12, %s295_s12 }
  0x29   :  { %342 = vmatprep.subr.bf16.mxu0 %v495_v0  ;;  %362 = vmatprep.subr.bf16.mxu1 %v495_v0  ;;  %v400_v12 = vld [vmem:[#allocation7 + $0x18] sm:$0xff]   ;;  %v395_v13 = vld [vmem:[#allocation5] sm:$0xff]   ;;  %v401_v15 = vld [vmem:[#allocation7 + $0x10] sm:$0xff]  }
  0x2a   :  { %v61_v14 = vld [vmem:[#allocation2] sm:$0xff]  ;;  %v402_v17 = vld [vmem:[#allocation7 + $0x8] sm:$0xff]   ;;  %v403_v18 = vld [vmem:[#allocation7] sm:$0xff]  }
  0x2b   :  { %v62_v16 = vpack.c.bf16 %v61_v14, %v61_v14  ;;  %v304_v19 = vld [vmem:[%s548_s2] ss:$0 sm:$0xff]  ;;  %s464_s2 = scalar_lea.vmem %s295_s12, 128 }
  0x2c   :  { %343 = vmatpush3.bf16.msra.mxu0 %v389_v2  ;;  %363 = vmatpush3.bf16.msra.mxu1 %v397_v6  ;;  %v313_v27 = vld [vmem:[%s550_s4] ss:$0 sm:$0xff]  ;;  %p465_p1 = scmp.ne.s32.totalorder %s295_s12, %s464_s2  ;;  %p470_p3 = scmp.lt.s32.totalorder %s464_s2, %s464_s2 }
  0x2d   :  { %344 = vmatprep.subr.bf16.mxu0 %v495_v0  ;;  %364 = vmatprep.subr.bf16.mxu1 %v495_v0 }
  0x2e   :  { %p471_p4 = por %p470_p3, %p469_p2 }
  0x30   :  { %345 = vmatpush3.bf16.msra.mxu0 %v390_v3  ;;  %365 = vmatpush3.bf16.msra.mxu1 %v398_v8  ;;  %p472_p5 = pnand %p471_p4, %p465_p1 }
  0x31   :  { %346 = vmatprep.subr.bf16.mxu0 %v495_v0  ;;  %366 = vmatprep.subr.bf16.mxu1 %v495_v0 }
  0x34   :  { %347 = vmatpush3.bf16.msra.mxu0 %v391_v5  ;;  %367 = vmatpush3.bf16.msra.mxu1 %v399_v10 }
  0x35   :  { %348 = vmatprep.subr.bf16.mxu0 %v495_v0  ;;  %368 = vmatprep.subr.bf16.mxu1 %v495_v0 }
  0x38   :  { %349 = vmatpush3.bf16.msra.mxu0 %v392_v7  ;;  %369 = vmatpush3.bf16.msra.mxu1 %v400_v12 }
  0x39   :  { %350 = vmatprep.subr.bf16.mxu0 %v495_v0  ;;  %370 = vmatprep.subr.bf16.mxu1 %v495_v0 }
  0x3c   :  { %351 = vmatpush3.bf16.msra.mxu0 %v393_v9  ;;  %371 = vmatpush3.bf16.msra.mxu1 %v401_v15 }
  0x3d   :  { %352 = vmatprep.subr.bf16.mxu0 %v495_v0  ;;  %372 = vmatprep.subr.bf16.mxu1 %v495_v0 }
  0x40   :  { %353 = vmatpush3.bf16.msra.mxu0 %v394_v11  ;;  %373 = vmatpush3.bf16.msra.mxu1 %v402_v17 }
  0x41   :  { %354 = vmatprep.subr.bf16.mxu0 %v495_v0  ;;  %374 = vmatprep.subr.bf16.mxu1 %v495_v0 }
  0x44   :  { %355 = vmatpush3.bf16.msra.mxu0 %v395_v13  ;;  %375 = vmatpush3.bf16.msra.mxu1 %v403_v18 }
  0x47   :  { %357 = vmatmul.mubr.bf16.vlgmr.msra.gmra.mxu0 %v62_v16 }
 0x107   :  { %v168_v20 = vpop.f32.mrf.mxu0 }
 0x108   :  { %v169_v21 = vadd.f32 %v304_v19, %v168_v20 }
 0x109   :  { %v358_v22 = vpop.f32.mrf.mxu0 }
 0x10a   :  { %v174_v23 = vmax.f32 %v169_v21, 0.0 }
 0x10b   :  { %v171_v24 = vpop.f32.mrf.mxu0 }
 0x10c   :  { %v175_v25 = vpack.c.bf16 %v174_v23, %v174_v23 }
 0x10d   :  { %v359_v26 = vpop.f32.mrf.mxu0 }
 0x10e   :  { %377 = vmatmul.mubr.bf16.vlgmr.msra.gmra.mxu1 %v175_v25 }
 0x1ce   :  { %v281_v28 = vpop.f32.mrf.mxu1 }
 0x1cf   :  { %v282_v29 = vadd.f32 %v313_v27, %v281_v28 }
 0x1d0   :  { %v378_v30 = vpop.f32.mrf.mxu1 }
 0x1d1   :  { %287 = vst [vmem:[#allocation8] sm:$0xff] %v282_v29 }
 0x1d2   :  { %v284_v31 = vpop.f32.mrf.mxu1 }
 0x1d3   :  { %475 = shalt.err (!%p472_p5)
}
 0x1d4   :  { %297 = dma.vmem_to_hbm [thread:$0]  %s295_s12, 128, %s551_s5, [#allocation4]   ;;  %v379_v32 = vpop.f32.mrf.mxu1 }
 0x1d5   :  { %488 = dma.done.wait [#allocation4], 128  }
 0x1d6   :  { %489 = vsyncadd [#allocation4], 4294967168 }
 0x1d7   :  { %301 = vsyncpa [#allocation3], 1 }
 0x1d8   :  { %302 = vsyncpa [#allocation6], 1 }
 0x1d9   :  { %303 = vsyncpa [#allocation4], 1 }

</bundles_post_ra>
